<compile_context>
chip_gen: v5e
topology: v5e:2x2
jax: 0.10.0
libtpu: 0.0.40
codegen_flags: <defaults>
</compile_context>

<pallas_src>
import jax
import jax.numpy as jnp
import numpy as np
from jax.experimental import pallas as pl
from jax.experimental.pallas import tpu as pltpu


_LANES = (512, 256, 128)            # lane-dense last-dim candidates
_TARGET_BLOCK_BYTES = 1 << 20       # ~1 MiB f32 blocks


def _round_up(a, b):
    return (a + b - 1) // b * b


def _pick_tile_rows(rows, lane):
    """Largest multiple of 8 that divides `rows` and keeps blocks ~1 MiB."""
    target = max(8, (_TARGET_BLOCK_BYTES // (lane * 4)) // 8 * 8)
    tile = min(rows, target)
    for tr in range(tile, 7, -8):
        if rows % tr == 0:
            return tr
    return 8  # rows is a multiple of 8, so 8 always divides it


def _layout(total):
    """Pick (lane, rows, tile_rows, padded_total); prefer padding-free layouts."""
    for lane in _LANES:
        if total % lane == 0:
            rows = total // lane
            if rows % 8 == 0:
                return lane, rows, _pick_tile_rows(rows, lane), total
    # Ragged total: fall back to zero padding (inert for the raw sums).
    lane = _LANES[0] if total >= _LANES[0] * 8 else _LANES[-1]
    rows = _round_up(pl.cdiv(total, lane), 8)
    target = max(8, (_TARGET_BLOCK_BYTES // (lane * 4)) // 8 * 8)
    tile_rows = min(rows, target)
    rows = _round_up(rows, tile_rows)
    return lane, rows, tile_rows, rows * lane


def _make_kernel(total):
    """Fused stats + flow kernel with the true element count baked in."""
    n = float(total)

    def kernel(params_ref, x_ref, o_ref, s_acc, ss_acc, c_ref):
        p = pl.program_id(0)          # 0 = stats pass, 1 = flow pass
        t = pl.program_id(1)          # tile index
        last_t = pl.num_programs(1) - 1

        @pl.when((p == 0) & (t == 0))
        def _init():
            s_acc[...] = jnp.zeros_like(s_acc)
            ss_acc[...] = jnp.zeros_like(ss_acc)

        @pl.when(p == 0)
        def _accumulate():
            x = x_ref[...]
            s_acc[...] += x                       # pure VPU adds
            ss_acc[...] += x * x

        @pl.when((p == 0) & (t == last_t))
        def _finalize_stats():
            s = jnp.sum(s_acc[...])               # single XLU reduction
            ss = jnp.sum(ss_acc[...])
            mean = s / n
            # torch .std() is unbiased (ddof=1); guard n==1 and cancellation.
            var = (ss - s * mean) / max(n - 1.0, 1.0)
            inv_std = jax.lax.rsqrt(jnp.maximum(var, 1e-12))
            vx, vy = params_ref[0], params_ref[1]
            wx, wy = params_ref[2], params_ref[3]
            afactor, mfactor = params_ref[4], params_ref[5]
            c_ref[0] = inv_std                    # scale
            c_ref[1] = -mean * inv_std            # shift
            c_ref[2] = 1.0 + vy
            c_ref[3] = vx
            c_ref[4] = 0.5 * (1.0 + wy)           # sigmoid(w)=0.5*(1+tanh(w/2))
            c_ref[5] = 0.5 * wx
            c_ref[6] = afactor
            c_ref[7] = mfactor

        @pl.when(p == 1)
        def _flow():
            scale, shift = c_ref[0], c_ref[1]
            one_vy, vx = c_ref[2], c_ref[3]
            half_one_wy, half_wx = c_ref[4], c_ref[5]
            afactor, mfactor = c_ref[6], c_ref[7]

            x = x_ref[...]
            d = x * scale + shift                 # (x - mean) * inv_std, fused
            th_d = jnp.tanh(d)                    # EUP push 1
            sig = 0.5 * jnp.tanh(d * half_one_wy + half_wx) + 0.5   # EUP push 2
            v = d * one_vy + vx
            dx = afactor * (v * sig)              # sum over size-1 dim == identity
            dy = mfactor * th_d
            o_ref[...] = (d * (1.0 + dy) + dx).astype(o_ref.dtype)

    return kernel


def optaeg_v3_forward(x, params):
    """OptAEGV3 forward. params: f32[6] = [vx, vy, wx, wy, afactor, mfactor]."""
    shape = x.shape
    flat = x.reshape(-1).astype(jnp.float32)
    total = flat.shape[0]                         # static python int

    lane, rows, tile_rows, padded = _layout(total)
    if padded != total:
        flat = jnp.pad(flat, (0, padded - total))
    x2d = flat.reshape(rows, lane)
    num_tiles = rows // tile_rows

    cost = pl.CostEstimate(
        flops=16 * padded,
        transcendentals=2 * padded,
        bytes_accessed=3 * padded * 4,
    )

    out2d = pl.pallas_call(
        _make_kernel(total),
        out_shape=jax.ShapeDtypeStruct((rows, lane), jnp.float32),
        grid_spec=pltpu.PrefetchScalarGridSpec(
            num_scalar_prefetch=0,
            grid=(2, num_tiles),
            in_specs=[
                pl.BlockSpec(memory_space=pltpu.MemorySpace.SMEM),      # params
                pl.BlockSpec((tile_rows, lane), lambda p, t: (t, 0)),   # data
            ],
            # Pin the output to block 0 during the stats pass (never flushed);
            # real tiles are written/flushed only during the flow pass.
            out_specs=pl.BlockSpec((tile_rows, lane), lambda p, t: (t * p, 0)),
            scratch_shapes=[
                pltpu.VMEM((tile_rows, lane), jnp.float32),   # sum accumulator
                pltpu.VMEM((tile_rows, lane), jnp.float32),   # sum-of-squares
                pltpu.SMEM((8,), jnp.float32),                # folded constants
            ],
        ),
        compiler_params=pltpu.CompilerParams(
            dimension_semantics=("arbitrary", "arbitrary"),
            vmem_limit_bytes=32 * 1024 * 1024,
        ),
        cost_estimate=cost,
    )(params.astype(jnp.float32), x2d)

    out = out2d.reshape(-1)
    if padded != total:
        out = out[:total]
    return out.reshape(shape)


def _reference_forward(x_nchw, params):
    """Pure-JAX re-implementation of the PyTorch forward (for verification)."""
    vx, vy, wx, wy, afactor, mfactor = (params[i] for i in range(6))
    shape = x_nchw.shape
    b = shape[0]
    d = x_nchw.reshape(b, -1).astype(jnp.float32)
    d = d - jnp.mean(d)
    d = d / jnp.std(d, ddof=1)                    # torch std is unbiased
    v = d[:, :, None] * (1.0 + vy) + vx
    w = d[:, :, None] * (1.0 + wy) + wx
    dx = afactor * jnp.sum(v * jax.nn.sigmoid(w), axis=-1)
    dy = mfactor * jnp.tanh(d)
    d = d * (1.0 + dy) + dx
    return d.reshape(shape)


if __name__ == "__main__":
    key = jax.random.PRNGKey(0)
    k1, k2, k3, k4 = jax.random.split(key, 4)

    # Default-init parameters of OptAEGV3: vx=0, vy=1, wx=0, wy=1, a=0, m=1.
    params_default = jnp.array([0.0, 1.0, 0.0, 1.0, 0.0, 1.0], dtype=jnp.float32)
    # Perturbed parameters so every term (incl. afactor * v * sigmoid(w)) is live.
    params_trained = params_default + 0.1 * jax.random.normal(k1, (6,), jnp.float32)

    x_small = jax.random.normal(k2, (2, 4, 16, 16), dtype=jnp.float32)    # 1 tile, no pad
    x_big = jax.random.normal(k3, (8, 16, 64, 64), dtype=jnp.float32)     # 2 tiles, no pad
    x_ragged = jax.random.normal(k4, (3, 5, 7, 11), dtype=jnp.float32)    # padded path

    fwd = jax.jit(optaeg_v3_forward)

    for x, p in ((x_small, params_default),
                 (x_small, params_trained),
                 (x_big, params_trained),
                 (x_ragged, params_trained)):
        out = jax.block_until_ready(fwd(x, p))
        ref = jax.block_until_ready(_reference_forward(x, p))
        np.testing.assert_allclose(np.asarray(out), np.asarray(ref),
                                   atol=1e-3, rtol=1e-3)

    print("KERNEL_OK")
</pallas_src>

<mosaic_0001>
module attributes {stable_mosaic.version = 11 : i64} {
  func.func @kernel(%arg0: i32, %arg1: i32, %arg2: memref<6xf32, #tpu.memory_space<smem>>, %arg3: memref<8x256xf32, #tpu.memory_space<vmem>>, %arg4: memref<8x256xf32, #tpu.memory_space<vmem>>, %arg5: memref<8x256xf32, #tpu.memory_space<vmem>>, %arg6: memref<8x256xf32, #tpu.memory_space<vmem>>, %arg7: memref<8xf32, #tpu.memory_space<smem>>) attributes {dimension_semantics = [#tpu.dimension_semantics<arbitrary>, #tpu.dimension_semantics<arbitrary>], iteration_bounds = array<i64: 2, 1>, scalar_prefetch = 0 : i64, scratch_operands = 3 : i64, tpu.core_type = #tpu.core_type<tc>, window_params = [{transform_indices = @transform_0, window_bounds = array<i64: 6>}, {transform_indices = @transform_1, window_bounds = array<i64: 8, 256>}, {transform_indices = @transform_2, window_bounds = array<i64: 8, 256>}]} {
    %c0_i32 = arith.constant 0 : i32
    %0 = arith.cmpi eq, %arg0, %c0_i32 : i32
    %c0_i32_0 = arith.constant 0 : i32
    %1 = arith.cmpi eq, %arg1, %c0_i32_0 : i32
    %2 = arith.andi %0, %1 : i1
    %3 = arith.extui %2 : i1 to i32
    %c0_i32_1 = arith.constant 0 : i32
    %4 = arith.cmpi ne, %3, %c0_i32_1 : i32
    scf.if %4 {
      %cst = arith.constant 0.000000e+00 : f32
      %16 = vector.broadcast %cst : f32 to vector<8x256xf32>
      %c0 = arith.constant 0 : index
      %c0_8 = arith.constant 0 : index
      %17 = vector.load %arg5[%c0, %c0_8] : memref<8x256xf32, #tpu.memory_space<vmem>>, vector<8x256xf32>
      tpu.vector_store %arg5[%c0, %c0_8], %16 {strides = array<i32>} : memref<8x256xf32, #tpu.memory_space<vmem>>, vector<8x256xf32>,
      %cst_9 = arith.constant 0.000000e+00 : f32
      %18 = vector.broadcast %cst_9 : f32 to vector<8x256xf32>
      %c0_10 = arith.constant 0 : index
      %c0_11 = arith.constant 0 : index
      %19 = vector.load %arg6[%c0_10, %c0_11] : memref<8x256xf32, #tpu.memory_space<vmem>>, vector<8x256xf32>
      tpu.vector_store %arg6[%c0_10, %c0_11], %18 {strides = array<i32>} : memref<8x256xf32, #tpu.memory_space<vmem>>, vector<8x256xf32>,
    } else {
    }
    %c0_i32_2 = arith.constant 0 : i32
    %5 = arith.cmpi eq, %arg0, %c0_i32_2 : i32
    %6 = arith.extui %5 : i1 to i32
    %c0_i32_3 = arith.constant 0 : i32
    %7 = arith.cmpi ne, %6, %c0_i32_3 : i32
    scf.if %7 {
      %c0 = arith.constant 0 : index
      %c0_8 = arith.constant 0 : index
      %16 = vector.load %arg3[%c0, %c0_8] : memref<8x256xf32, #tpu.memory_space<vmem>>, vector<8x256xf32>
      %c0_9 = arith.constant 0 : index
      %c0_10 = arith.constant 0 : index
      %17 = vector.load %arg5[%c0_9, %c0_10] : memref<8x256xf32, #tpu.memory_space<vmem>>, vector<8x256xf32>
      %18 = arith.addf %17, %16 : vector<8x256xf32>
      %c0_11 = arith.constant 0 : index
      %c0_12 = arith.constant 0 : index
      %19 = vector.load %arg5[%c0_11, %c0_12] : memref<8x256xf32, #tpu.memory_space<vmem>>, vector<8x256xf32>
      tpu.vector_store %arg5[%c0_11, %c0_12], %18 {strides = array<i32>} : memref<8x256xf32, #tpu.memory_space<vmem>>, vector<8x256xf32>,
      %c0_13 = arith.constant 0 : index
      %c0_14 = arith.constant 0 : index
      %20 = vector.load %arg6[%c0_13, %c0_14] : memref<8x256xf32, #tpu.memory_space<vmem>>, vector<8x256xf32>
      %21 = arith.mulf %16, %16 : vector<8x256xf32>
      %22 = arith.addf %20, %21 : vector<8x256xf32>
      %c0_15 = arith.constant 0 : index
      %c0_16 = arith.constant 0 : index
      %23 = vector.load %arg6[%c0_15, %c0_16] : memref<8x256xf32, #tpu.memory_space<vmem>>, vector<8x256xf32>
      tpu.vector_store %arg6[%c0_15, %c0_16], %22 {strides = array<i32>} : memref<8x256xf32, #tpu.memory_space<vmem>>, vector<8x256xf32>,
    } else {
    }
    %c0_i32_4 = arith.constant 0 : i32
    %8 = arith.cmpi eq, %arg0, %c0_i32_4 : i32
    %c0_i32_5 = arith.constant 0 : i32
    %9 = arith.cmpi eq, %arg1, %c0_i32_5 : i32
    %10 = arith.andi %8, %9 : i1
    %11 = arith.extui %10 : i1 to i32
    %c0_i32_6 = arith.constant 0 : i32
    %12 = arith.cmpi ne, %11, %c0_i32_6 : i32
    scf.if %12 {
      %c0 = arith.constant 0 : index
      %c0_8 = arith.constant 0 : index
      %16 = vector.load %arg5[%c0, %c0_8] : memref<8x256xf32, #tpu.memory_space<vmem>>, vector<8x256xf32>
      %17 = vector.shape_cast %16 : vector<8x256xf32> to vector<1x8x256xf32>
      %cst = arith.constant dense<0.000000e+00> : vector<1xf32>
      %18 = vector.multi_reduction <add>, %17, %cst [1, 2] : vector<1x8x256xf32> to vector<1xf32>
      %19 = vector.shape_cast %18 : vector<1xf32> to vector<1x1x1xf32>
      %20 = vector.extract %19[0, 0, 0] : f32 from vector<1x1x1xf32>
      %c0_9 = arith.constant 0 : index
      %c0_10 = arith.constant 0 : index
      %21 = vector.load %arg6[%c0_9, %c0_10] : memref<8x256xf32, #tpu.memory_space<vmem>>, vector<8x256xf32>
      %22 = vector.shape_cast %21 : vector<8x256xf32> to vector<1x8x256xf32>
      %cst_11 = arith.constant dense<0.000000e+00> : vector<1xf32>
      %23 = vector.multi_reduction <add>, %22, %cst_11 [1, 2] : vector<1x8x256xf32> to vector<1xf32>
      %24 = vector.shape_cast %23 : vector<1xf32> to vector<1x1x1xf32>
      %25 = vector.extract %24[0, 0, 0] : f32 from vector<1x1x1xf32>
      %cst_12 = arith.constant 2.048000e+03 : f32
      %26 = arith.divf %20, %cst_12 : f32
      %27 = arith.mulf %20, %26 : f32
      %28 = arith.subf %25, %27 : f32
      %cst_13 = arith.constant 2.047000e+03 : f32
      %29 = arith.divf %28, %cst_13 : f32
      %cst_14 = arith.constant 9.99999996E-13 : f32
      %30 = arith.maximumf %29, %cst_14 : f32
      %31 = math.rsqrt %30 : f32
      %c0_15 = arith.constant 0 : index
      %32 = memref.load %arg2[%c0_15] : memref<6xf32, #tpu.memory_space<smem>>
      %c1 = arith.constant 1 : index
      %33 = memref.load %arg2[%c1] : memref<6xf32, #tpu.memory_space<smem>>
      %c2 = arith.constant 2 : index
      %34 = memref.load %arg2[%c2] : memref<6xf32, #tpu.memory_space<smem>>
      %c3 = arith.constant 3 : index
      %35 = memref.load %arg2[%c3] : memref<6xf32, #tpu.memory_space<smem>>
      %c4 = arith.constant 4 : index
      %36 = memref.load %arg2[%c4] : memref<6xf32, #tpu.memory_space<smem>>
      %c5 = arith.constant 5 : index
      %37 = memref.load %arg2[%c5] : memref<6xf32, #tpu.memory_space<smem>>
      %c0_16 = arith.constant 0 : index
      %38 = memref.load %arg7[%c0_16] : memref<8xf32, #tpu.memory_space<smem>>
      memref.store %31, %arg7[%c0_16] : memref<8xf32, #tpu.memory_space<smem>>
      %cst_17 = arith.constant 0.000000e+00 : f32
      %39 = arith.subf %cst_17, %26 : f32
      %40 = arith.mulf %39, %31 : f32
      %c1_18 = arith.constant 1 : index
      %41 = memref.load %arg7[%c1_18] : memref<8xf32, #tpu.memory_space<smem>>
      memref.store %40, %arg7[%c1_18] : memref<8xf32, #tpu.memory_space<smem>>
      %cst_19 = arith.constant 1.000000e+00 : f32
      %42 = arith.addf %cst_19, %33 : f32
      %c2_20 = arith.constant 2 : index
      %43 = memref.load %arg7[%c2_20] : memref<8xf32, #tpu.memory_space<smem>>
      memref.store %42, %arg7[%c2_20] : memref<8xf32, #tpu.memory_space<smem>>
      %c3_21 = arith.constant 3 : index
      %44 = memref.load %arg7[%c3_21] : memref<8xf32, #tpu.memory_space<smem>>
      memref.store %32, %arg7[%c3_21] : memref<8xf32, #tpu.memory_space<smem>>
      %cst_22 = arith.constant 1.000000e+00 : f32
      %45 = arith.addf %cst_22, %35 : f32
      %cst_23 = arith.constant 5.000000e-01 : f32
      %46 = arith.mulf %cst_23, %45 : f32
      %c4_24 = arith.constant 4 : index
      %47 = memref.load %arg7[%c4_24] : memref<8xf32, #tpu.memory_space<smem>>
      memref.store %46, %arg7[%c4_24] : memref<8xf32, #tpu.memory_space<smem>>
      %cst_25 = arith.constant 5.000000e-01 : f32
      %48 = arith.mulf %cst_25, %34 : f32
      %c5_26 = arith.constant 5 : index
      %49 = memref.load %arg7[%c5_26] : memref<8xf32, #tpu.memory_space<smem>>
      memref.store %48, %arg7[%c5_26] : memref<8xf32, #tpu.memory_space<smem>>
      %c6 = arith.constant 6 : index
      %50 = memref.load %arg7[%c6] : memref<8xf32, #tpu.memory_space<smem>>
      memref.store %36, %arg7[%c6] : memref<8xf32, #tpu.memory_space<smem>>
      %c7 = arith.constant 7 : index
      %51 = memref.load %arg7[%c7] : memref<8xf32, #tpu.memory_space<smem>>
      memref.store %37, %arg7[%c7] : memref<8xf32, #tpu.memory_space<smem>>
    } else {
    }
    %c1_i32 = arith.constant 1 : i32
    %13 = arith.cmpi eq, %arg0, %c1_i32 : i32
    %14 = arith.extui %13 : i1 to i32
    %c0_i32_7 = arith.constant 0 : i32
    %15 = arith.cmpi ne, %14, %c0_i32_7 : i32
    scf.if %15 {
      %c0 = arith.constant 0 : index
      %16 = memref.load %arg7[%c0] : memref<8xf32, #tpu.memory_space<smem>>
      %c1 = arith.constant 1 : index
      %17 = memref.load %arg7[%c1] : memref<8xf32, #tpu.memory_space<smem>>
      %c2 = arith.constant 2 : index
      %18 = memref.load %arg7[%c2] : memref<8xf32, #tpu.memory_space<smem>>
      %c3 = arith.constant 3 : index
      %19 = memref.load %arg7[%c3] : memref<8xf32, #tpu.memory_space<smem>>
      %c4 = arith.constant 4 : index
      %20 = memref.load %arg7[%c4] : memref<8xf32, #tpu.memory_space<smem>>
      %c5 = arith.constant 5 : index
      %21 = memref.load %arg7[%c5] : memref<8xf32, #tpu.memory_space<smem>>
      %c6 = arith.constant 6 : index
      %22 = memref.load %arg7[%c6] : memref<8xf32, #tpu.memory_space<smem>>
      %c7 = arith.constant 7 : index
      %23 = memref.load %arg7[%c7] : memref<8xf32, #tpu.memory_space<smem>>
      %c0_8 = arith.constant 0 : index
      %c0_9 = arith.constant 0 : index
      %24 = vector.load %arg3[%c0_8, %c0_9] : memref<8x256xf32, #tpu.memory_space<vmem>>, vector<8x256xf32>
      %25 = vector.broadcast %16 : f32 to vector<8x256xf32>
      %26 = arith.mulf %24, %25 : vector<8x256xf32>
      %27 = vector.broadcast %17 : f32 to vector<8x256xf32>
      %28 = arith.addf %26, %27 : vector<8x256xf32>
      %29 = math.tanh %28 : vector<8x256xf32>
      %30 = vector.broadcast %20 : f32 to vector<8x256xf32>
      %31 = arith.mulf %28, %30 : vector<8x256xf32>
      %32 = vector.broadcast %21 : f32 to vector<8x256xf32>
      %33 = arith.addf %31, %32 : vector<8x256xf32>
      %34 = math.tanh %33 : vector<8x256xf32>
      %cst = arith.constant 5.000000e-01 : f32
      %35 = vector.broadcast %cst : f32 to vector<8x256xf32>
      %36 = arith.mulf %35, %34 : vector<8x256xf32>
      %cst_10 = arith.constant 5.000000e-01 : f32
      %37 = vector.broadcast %cst_10 : f32 to vector<8x256xf32>
      %38 = arith.addf %36, %37 : vector<8x256xf32>
      %39 = vector.broadcast %18 : f32 to vector<8x256xf32>
      %40 = arith.mulf %28, %39 : vector<8x256xf32>
      %41 = vector.broadcast %19 : f32 to vector<8x256xf32>
      %42 = arith.addf %40, %41 : vector<8x256xf32>
      %43 = arith.mulf %42, %38 : vector<8x256xf32>
      %44 = vector.broadcast %22 : f32 to vector<8x256xf32>
      %45 = arith.mulf %44, %43 : vector<8x256xf32>
      %46 = vector.broadcast %23 : f32 to vector<8x256xf32>
      %47 = arith.mulf %46, %29 : vector<8x256xf32>
      %cst_11 = arith.constant 1.000000e+00 : f32
      %48 = vector.broadcast %cst_11 : f32 to vector<8x256xf32>
      %49 = arith.addf %48, %47 : vector<8x256xf32>
      %50 = arith.mulf %28, %49 : vector<8x256xf32>
      %51 = arith.addf %50, %45 : vector<8x256xf32>
      %c0_12 = arith.constant 0 : index
      %c0_13 = arith.constant 0 : index
      %52 = vector.load %arg4[%c0_12, %c0_13] : memref<8x256xf32, #tpu.memory_space<vmem>>, vector<8x256xf32>
      tpu.vector_store %arg4[%c0_12, %c0_13], %51 {strides = array<i32>} : memref<8x256xf32, #tpu.memory_space<vmem>>, vector<8x256xf32>,
    } else {
    }
    return
  }
  func.func @transform_0(%arg0: i32, %arg1: i32) -> i32 {
    %c0_i32 = arith.constant 0 : i32
    %c0_i32_0 = arith.constant 0 : i32
    return %c0_i32 : i32
  }
  func.func @transform_1(%arg0: i32, %arg1: i32) -> (i32, i32) {
    %c0_i32 = arith.constant 0 : i32
    %c0_i32_0 = arith.constant 0 : i32
    return %arg1, %c0_i32 : i32, i32
  }
  func.func @transform_2(%arg0: i32, %arg1: i32) -> (i32, i32) {
    %0 = arith.muli %arg1, %arg0 : i32
    %c0_i32 = arith.constant 0 : i32
    %c0_i32_0 = arith.constant 0 : i32
    return %0, %c0_i32 : i32, i32
  }
}

</mosaic_0001>

<bundles_post_ra>
// kernel: optaeg_v3_forward.1
= control target key start
LH: loop header
LB: loop body
LE: loop exit
PB: predicated region body
PF: predicated region fallthrough
CT: control target
= control target key end

     0   :  { %7 = vsyncpa [#allocation6], 0  ;;  %s582_s9 = smov 0   ;;  %s584_s10 = smov 0   ;;  %s640_s0 = inlined_call_operand.vmem [shape: f32[6], index: 0, kind: input, shape index: {}]   ;;  %s641_s1 = inlined_call_operand.vmem [shape: f32[8,256], index: 1, kind: input, shape index: {}]   ;;  %s642_s2 = inlined_call_operand.vmem [shape: f32[8,256], index: 2, kind: output, shape index: {}]  }
   0x1   :  { %s586_s11 = smov 0  }
   0x2 LB: > { %s429_s12 = sadd.s32 4294967295, %s560_s11   ;;  %s25_s13 = sadd.s32 1, %s556_s10  ;;  %s560_s11 = sphi %s586_s11, %s13_s11   ;;  %s556_s10 = sphi %s584_s10, %s644_s10   ;;  %s552_s9 = sphi %s582_s9, %s643_s9  }
   0x3   : > { %p27_p0 = scmp.ge.s32.totalorder %s25_s13, 2  ;;  %p431_p1 = scmp.ge.s32.totalorder %s560_s11, 1 }
   0x4   : > { %p105_p2 = scmp.lt.s32.totalorder %s560_s11, 3  ;;  %p474_p4 = scmp.eq.s32.totalorder %s429_s12, 0 }
   0x5   : > { %s646_s13 = smov (%p27_p0, %s25_s13), 0  ;;  %s117_s16 = sshll.u32 %s640_s0, 4  ;;  %s118_s16 = int_to_ptr.vmem [resolvable:$true] %s117_s16 }
   0x6   : > { %p106_p3 = pnand %p431_p1, %p105_p2  ;;  %s562_s17 = smov [#allocation5]  }
   0x8   : > { %p470_p5 = pneg %p106_p3  ;;  %138 = sbr.rel (%p106_p3) target bundleno = 348 (0x15c), region = 28 }
   0xa   : > { %p471_p6 = pnand %p474_p4, %p470_p5 }
   0xc   : > { %473 = dma.vmem_to_smem (!%p471_p6), %s118_s16, 16, %s562_s17, [#allocation6]  }
   0xd   : > { %547 = dma.done.wait (%p474_p4), [#allocation6], 16  }
   0xe   : > { %549 = vsyncadd (%p474_p4), [#allocation6], 4294967280 }
   0xf   : > { %145 = sfence }
  0x10   : > { %p175_p7 = scmp.eq.s32.totalorder %s552_s9, 0 }
  0x11   : > { %v563_v0 = vmov (%p175_p7), 0.0  }
  0x12   : > { %180 = sbr.rel (!%p175_p7) target bundleno = 23 (0x17), region = 36  ;;  %181 = vst [vmem:[#allocation2] sm:$0xff] (%p175_p7), %v563_v0 }
  0x13   : > { %182 = vst [vmem:[#allocation2 + $0x8] sm:$0xff] (%p175_p7), %v563_v0 }
  0x14   : > { %183 = vst [vmem:[#allocation3 + $0x8] sm:$0xff] (%p175_p7), %v563_v0 }
  0x15   : > { %184 = vst [vmem:[#allocation3] sm:$0xff] (%p175_p7), %v563_v0 }
  0x17 PF: > { %p437_p8 = scmp.ne.s32.totalorder %s552_s9, 0 }
  0x19   : > { %187 = sbr.rel (%p437_p8) target bundleno = 38 (0x26), region = 40 }
  0x1e   : > { %v188_v1 = vld [vmem:[%s641_s1] sm:$0xff]  ;;  %v189_v3 = vld [vmem:[%s641_s1 + $0x8] sm:$0xff]  ;;  %v196_v6 = vld [vmem:[#allocation3 + $0x8] sm:$0xff] }
  0x1f   : > { %v190_v2 = vld [vmem:[#allocation2] sm:$0xff]  ;;  %v191_v5 = vld [vmem:[#allocation2 + $0x8] sm:$0xff]  ;;  %v198_v7 = vmul.f32 %v188_v1, %v188_v1  ;;  %v197_v8 = vld [vmem:[#allocation3] sm:$0xff]  ;;  %v199_v9 = vmul.f32 %v189_v3, %v189_v3 }
  0x20   : > { %v192_v4 = vadd.f32 %v190_v2, %v188_v1  ;;  %v193_v10 = vadd.f32 %v191_v5, %v189_v3 }
  0x21   : > { %v200_v11 = vadd.f32 %v198_v7, %v196_v6  ;;  %v201_v12 = vadd.f32 %v199_v9, %v197_v8 }
  0x22   : > { %194 = vst [vmem:[#allocation2] sm:$0xff] %v192_v4 }
  0x23   : > { %195 = vst [vmem:[#allocation2 + $0x8] sm:$0xff] %v193_v10 }
  0x24   : > { %202 = vst [vmem:[#allocation3 + $0x8] sm:$0xff] %v200_v11 }
  0x25   : > { %203 = vst [vmem:[#allocation3] sm:$0xff] %v201_v12 }
  0x26 PF: > { %205 = sbr.rel (!%p175_p7) target bundleno = 313 (0x139), region = 44  ;;  %v564_v19 = vmov (%p175_p7), 2048.0   ;;  %v565_v20 = vmov (%p175_p7), 2047.0   ;;  %s440_s22 = sld [smem:[#allocation5 + $0x3]] (%p175_p7) }
  0x27   : > { %505 = vrcp.f32 (%p175_p7), %v564_v19  ;;  %s438_s23 = sld [smem:[#allocation5 + $0x1]] (%p175_p7)  ;;  %s566_s16 = smov (%p175_p7), 1e-12  }
  0x28   : > { %507 = vrcp.f32 (%p175_p7), %v565_v20  ;;  %s439_s24 = sld [smem:[#allocation5 + $0x2]] (%p175_p7) }
  0x29   : > { %v206_v13 = vld [vmem:[#allocation2] sm:$0xff] (%p175_p7)  ;;  %s263_s25 = sld [smem:[#allocation5]] (%p175_p7) }
  0x2a   : > { %v207_v14 = vld [vmem:[#allocation2 + $0x8] sm:$0xff] (%p175_p7)  ;;  %s441_s26 = sld [smem:[#allocation5 + $0x4]] (%p175_p7) }
  0x2b   : > { %v208_v15 = vadd.f32 %v207_v14, %v206_v13  ;;  %v218_v16 = vld [vmem:[#allocation3 + $0x8] sm:$0xff]  ;;  %s442_s27 = sld [smem:[#allocation5 + $0x5]] }
  0x2c   : > { %v219_v17 = vld [vmem:[#allocation3] sm:$0xff]  ;;  %s280_s28 = sadd.f32 1.0, %s440_s22 }
  0x2d   : > { %209 = vadd.xlane.f32.xlu0 %v208_v15  ;;  %v220_v18 = vadd.f32 %v219_v17, %v218_v16  ;;  %v506_v21 = vpop.eup %505  ;;  %s275_s29 = sadd.f32 1.0, %s438_s23 }
  0x2e   : > { %v508_v23 = vpop.eup %507  ;;  %v231_v26 = vmul.f32 2048.0, %v506_v21  ;;  %vm235_vm0 = vweird.f32 %v506_v21  ;;  %s281_s30 = smul.f32 0.5, %s280_s28 }
  0x2f   : > { %v242_v27 = vmul.f32 2047.0, %v508_v23  ;;  %vm246_vm1 = vweird.f32 %v508_v23  ;;  %277 = sst [smem:[#allocation4 + $0x2]] %s275_s29  ;;  %s284_s3 = smul.f32 0.5, %s439_s24 }
  0x30   : > { %v232_v30 = vsub.f32 1.0, %v231_v26  ;;  %279 = sst [smem:[#allocation4 + $0x3]] %s263_s25 }
  0x31   : > { %v243_v32 = vsub.f32 1.0, %v242_v27  ;;  %283 = sst [smem:[#allocation4 + $0x4]] %s281_s30 }
  0x32   : > { %v233_v37 = vmul.f32 %v506_v21, %v232_v30  ;;  %286 = sst [smem:[#allocation4 + $0x5]] %s284_s3 }
  0x33   : > { %v244_v38 = vmul.f32 %v508_v23, %v243_v32  ;;  %288 = sst [smem:[#allocation4 + $0x6]] %s441_s26 }
  0x34   : > { %v234_v41 = vadd.f32 %v506_v21, %v233_v37  ;;  %290 = sst [smem:[#allocation4 + $0x7]] %s442_s27 }
  0x35   : > { %221 = vadd.xlane.f32.xlu0 %v220_v18  ;;  %v245_v42 = vadd.f32 %v508_v23, %v244_v38 }
  0x36   : > { %v236_v45 = vsel %vm235_vm0, %v506_v21, %v234_v41 }
  0x37   : > { %v247_v46 = vsel %vm246_vm1, %v508_v23, %v245_v42 }
  0xa0   : > { %v210_v22 = vpop.xlane.xlu0 %209 }
  0xa1   : > { %v211_v24 = vrot.slane %v210_v22, 4 }
  0xa3   : > { %v212_v25 = vadd.f32 %v211_v24, %v210_v22 }
  0xa5   : > { %v213_v28 = vrot.slane %v212_v25, 2 }
  0xa7   : > { %v214_v29 = vadd.f32 %v213_v28, %v212_v25 }
  0xa8   : > { %v222_v31 = vpop.xlane.xlu0 %221 }
  0xa9   : > { %v223_v33 = vrot.slane %v222_v31, 4  ;;  %v215_v34 = vrot.slane %v214_v29, 1 }
  0xab   : > { %v224_v35 = vadd.f32 %v223_v33, %v222_v31  ;;  %v216_v36 = vadd.f32 %v215_v34, %v214_v29 }
  0xad   : > { %v225_v39 = vrot.slane %v224_v35, 2  ;;  %456 = vpush %v216_v36 }
  0xaf   : > { %v226_v40 = vadd.f32 %v225_v39, %v224_v35 }
  0xb1   : > { %v227_v43 = vrot.slane %v226_v40, 1 }
  0xb3   : > { %v228_v44 = vadd.f32 %v227_v43, %v226_v40 }
  0xb5   : > { %458 = vpush %v228_v44 }
  0xb6   : > { %460 = vpush %v236_v45 }
  0xb7   : > { %462 = vpush %v247_v46 }
  0xde   : > { %s457_s4 = spop %456 }
  0xe6   : > { %s459_s5 = spop %458 }
  0xe7   : > { %s461_s6 = spop %460 }
  0xe8   : > { %s238_s7 = smul.f32 %s461_s6, %s457_s4  ;;  %s463_s12 = spop %462 }
  0xea   : > { %s239_s8 = smul.f32 %s457_s4, %s238_s7  ;;  %s271_s18 = ssub.f32 0.0, %s238_s7 }
  0xec   : > { %s240_s14 = ssub.f32 %s459_s5, %s239_s8 }
  0xee   : > { %s249_s15 = smul.f32 %s463_s12, %s240_s14 }
  0xf0   : > { %s250_s17 = smax.f32 %s566_s16, %s249_s15 }
  0xf1   : > { %v251_v47 = vstv %s250_s17 }
  0xf2   : > { %509 = vrsqrt.f32 %v251_v47  ;;  %vm258_vm3 = vweird.f32 %v251_v47 }
  0xf8   : > { %v510_v48 = vpop.eup %509 }
  0xf9   : > { %v253_v49 = vmul.f32 %v510_v48, %v251_v47  ;;  %vm259_vm2 = vweird.f32 %v510_v48 }
  0xfa   : > { %vm260_vm4 = vmor %vm258_vm3, %vm259_vm2 }
  0xfb   : > { %v254_v50 = vmul.f32 %v510_v48, %v253_v49 }
  0xfd   : > { %v255_v51 = vmul.f32 0.5, %v254_v50 }
  0xff   : > { %v256_v52 = vsub.f32 1.5, %v255_v51 }
 0x101   : > { %v257_v53 = vmul.f32 %v510_v48, %v256_v52 }
 0x103   : > { %v261_v54 = vsel %vm260_vm4, %v510_v48, %v257_v53 }
 0x104   : > { %464 = vpush %v261_v54 }
 0x135   : > { %s465_s19 = spop %464 }
 0x136   : > { %270 = sst [smem:[#allocation4]] %s465_s19  ;;  %s272_s20 = smul.f32 %s465_s19, %s271_s18 }
 0x138   : > { %274 = sst [smem:[#allocation4 + $0x1]] %s272_s20 }
 0x139 PF: > { %p443_p9 = scmp.ne.s32.totalorder %s552_s9, 1 }
 0x13a   : > { %s295_s21 = sld [smem:[#allocation4]] (!%p443_p9) }
 0x13b   : > { %294 = sbr.rel (%p443_p9) target bundleno = 348 (0x15c), region = 48  ;;  %s444_s22 = sld [smem:[#allocation4 + $0x1]] (!%p443_p9) }
 0x13c   : > { %s447_s23 = sld [smem:[#allocation4 + $0x4]] (!%p443_p9) }
 0x13d   : > { %s448_s28 = sld [smem:[#allocation4 + $0x5]] (!%p443_p9) }
 0x13e   : > { %s445_s29 = sld [smem:[#allocation4 + $0x2]] (!%p443_p9) }
 0x13f   : > { %s450_s30 = sld [smem:[#allocation4 + $0x7]] (!%p443_p9) }
 0x140   : > { %v303_v55 = vld [vmem:[%s641_s1] sm:$0xff]  ;;  %v304_v56 = vld [vmem:[%s641_s1 + $0x8] sm:$0xff]  ;;  %v305_v57 = vstv %s295_s21  ;;  %s446_s9 = sld [smem:[#allocation4 + $0x3]] }
 0x141   : > { %v306_v58 = vmul.f32 %v305_v57, %v303_v55  ;;  %v308_v59 = vstv %s444_s22  ;;  %v307_v60 = vmul.f32 %v305_v57, %v304_v56  ;;  %s449_s3 = sld [smem:[#allocation4 + $0x6]] }
 0x142   : > { %v313_v63 = vstv %s447_s23 }
 0x143   : > { %v309_v61 = vadd.f32 %v308_v59, %v306_v58  ;;  %v310_v62 = vadd.f32 %v308_v59, %v307_v60  ;;  %v316_v1 = vstv %s448_s28 }
 0x144   : > { %v325_v5 = vstv %s445_s29 }
 0x145   : > { %511 = vtanh.f32 %v309_v61  ;;  %v314_v0 = vmul.f32 %v313_v63, %v309_v61  ;;  %v315_v2 = vmul.f32 %v313_v63, %v310_v62  ;;  %v336_v6 = vstv %s450_s30 }
 0x146   : > { %513 = vtanh.f32 %v310_v62  ;;  %v326_v9 = vmul.f32 %v325_v5, %v309_v61  ;;  %v328_v11 = vstv %s446_s9  ;;  %v327_v12 = vmul.f32 %v325_v5, %v310_v62 }
 0x147   : > { %v317_v3 = vadd.f32 %v316_v1, %v314_v0  ;;  %v318_v4 = vadd.f32 %v316_v1, %v315_v2  ;;  %v333_v23 = vstv %s449_s3 }
 0x148   : > { %v329_v17 = vadd.f32 %v328_v11, %v326_v9  ;;  %v330_v20 = vadd.f32 %v328_v11, %v327_v12 }
 0x149   : > { %515 = vtanh.f32 %v317_v3 }
 0x14a   : > { %517 = vtanh.f32 %v318_v4 }
 0x14b   : > { %v512_v7 = vpop.eup %511 }
 0x14c   : > { %v514_v8 = vpop.eup %513  ;;  %v337_v10 = vmul.f32 %v512_v7, %v336_v6 }
 0x14d   : > { %v338_v13 = vmul.f32 %v514_v8, %v336_v6 }
 0x14e   : > { %v339_v18 = vadd.f32 1.0, %v337_v10 }
 0x14f   : > { %v516_v14 = vpop.eup %515  ;;  %v340_v21 = vadd.f32 1.0, %v338_v13 }
 0x150   : > { %v518_v15 = vpop.eup %517  ;;  %v321_v16 = vmul.f32 0.5, %v516_v14  ;;  %v341_v26 = vmul.f32 %v339_v18, %v309_v61 }
 0x151   : > { %v322_v19 = vmul.f32 0.5, %v518_v15  ;;  %v342_v28 = vmul.f32 %v340_v21, %v310_v62 }
 0x152   : > { %v323_v22 = vadd.f32 0.5, %v321_v16 }
 0x153   : > { %v324_v24 = vadd.f32 0.5, %v322_v19 }
 0x154   : > { %v331_v25 = vmul.f32 %v329_v17, %v323_v22 }
 0x155   : > { %v332_v27 = vmul.f32 %v330_v20, %v324_v24 }
 0x156   : > { %v334_v29 = vmul.f32 %v333_v23, %v331_v25 }
 0x157   : > { %v335_v30 = vmul.f32 %v333_v23, %v332_v27 }
 0x158   : > { %v343_v31 = vadd.f32 %v341_v26, %v334_v29 }
 0x159   : > { %v344_v32 = vadd.f32 %v342_v28, %v335_v30 }
 0x15a   : > { %345 = vst [vmem:[%s642_s2] sm:$0xff] %v343_v31 }
 0x15b   : > { %346 = vst [vmem:[%s642_s2 + $0x8] sm:$0xff] %v344_v32 }
 0x15c PF: > { %s13_s11 = sadd.s32 1, %s560_s11   ;;  %s643_s9 = smov %s556_s10 }
 0x15d   : > { %p10_p10 = scmp.ge.s32.totalorder %s13_s11, 4   ;;  %s644_s10 = smov %s646_s13 }
 0x15f   :  { %12 = sbr.rel (!%p10_p10) target bundleno = 2 (0x2), region = 87 }
 0x164   :  { %371 = vsyncpa [#allocation6], 1 }
 0x165   :  { %373 = vsyncpa [#allocation6 + $0x1], 1 }

</bundles_post_ra>
